<compile_context>
chip_gen: v7x
topology: tpu7x:2x2x1
jax: 0.10.0
libtpu: 0.0.40
codegen_flags: <defaults>
</compile_context>

<pallas_src>
import jax
import jax.numpy as jnp
from jax.experimental import pallas as pl
from jax.experimental.pallas import tpu as pltpu


# ----------------------------------------------------------------------------
# Kernel
# ----------------------------------------------------------------------------
def project_attention_kernel(
    img_ref,    # (1, L, TK)      image features for batch b, K-tile k
    v_ref,      # (1, 1, H_pad)   per-batch folded vector q_fa_b * wlc[:, 0]
    wcat_ref,   # (TK, 2*H_pad)   [W_fc | W_gate] of the image GatedTanh
    bcat_ref,   # (1, 2*H_pad)    [b_fc | b_gate]
    out_ref,    # (1, 1, L)       attention weights for batch b (lane-dense)
    acc_ref,    # (L, 2*H_pad) f32 matmul accumulator (persists across K-tiles)
):
    k = pl.program_id(1)

    @pl.when(k == 0)
    def _():
        acc_ref[...] = jnp.zeros_like(acc_ref)

    # Fused fc+gate matmul for this K slice (MXU, f32 accumulation).
    acc_ref[...] += jnp.dot(
        img_ref[0], wcat_ref[...], preferred_element_type=jnp.float32
    )

    @pl.when(k == pl.num_programs(1) - 1)
    def _():
        h = acc_ref.shape[1] // 2                      # == H_pad (lane aligned)
        z = acc_ref[...] + bcat_ref[...]               # (L, 2*H_pad)
        # GatedTanh; both slices start on a 128-lane boundary -> free.
        img_fa = jnp.tanh(z[:, :h]) * jax.nn.sigmoid(z[:, h:])   # (L, H_pad)

        # Folded lc projection: logits[l] = sum_h img_fa[l,h] * v[h].
        # Computed as (1, H_pad) x (L, H_pad)^T so the logits come out as a
        # lane-major (1, L) row (padded columns contribute exactly 0).
        logits = jax.lax.dot_general(
            v_ref[0], img_fa,
            dimension_numbers=(((1,), (1,)), ((), ())),
            preferred_element_type=jnp.float32,
        )                                              # (1, L)
        # (lc bias is constant over L -> cancels under softmax; dropped.)

        # Softmax over locations, lane-axis reductions, exact division.
        m = jnp.max(logits, axis=-1, keepdims=True)
        e = jnp.exp(logits - m)
        att = e / jnp.sum(e, axis=-1, keepdims=True)   # (1, L)

        out_ref[0] = att.astype(out_ref.dtype)


# ----------------------------------------------------------------------------
# Planning helpers
# ----------------------------------------------------------------------------
def _round_up(x, m):
    return (x + m - 1) // m * m


def _vmem_limit_bytes():
    """Per-generation VMEM limit (v5e/v6e: 128 MiB, v7x: 64 MiB physical)."""
    try:
        cap = pltpu.get_tpu_info().vmem_capacity_bytes
    except Exception:
        cap = 64 << 20          # conservative fallback (v7x physical)
    return int(cap * 0.85)


def _plan(d_img, l, h_pad, itemsize, vmem_limit):
    """Return (tk, resident).

    resident=True  -> full-K weight block, single-buffered (loaded once).
    resident=False -> K-tiled weight, tk chosen against the real budget with
                      double-buffering accounted for; falls back to 128.
    """
    two_h = 2 * h_pad
    acc_bytes = l * two_h * 4                               # f32 accumulator
    misc = 2 * (h_pad * 4) + 2 * (two_h * 4) + 2 * (l * 4) + (1 << 20)
    budget = vmem_limit - acc_bytes - misc

    w_full = d_img * two_h * itemsize                       # single-buffered
    img_full = 2 * l * d_img * itemsize                     # double-buffered
    if w_full + img_full <= budget:
        return d_img, True

    if d_img % 128 != 0:
        # TODO(synk): pad D_img to a 128 multiple for large, odd D_img.
        return d_img, False

    tk = 128
    for cand in range(128, d_img, 128):
        if d_img % cand == 0:
            need = (2 * cand * two_h + 2 * l * cand) * itemsize
            if need <= budget:
                tk = cand
    return tk, False


# ----------------------------------------------------------------------------
# Wrapper
# ----------------------------------------------------------------------------
def prepare_params(params, *, matmul_dtype=jnp.float32):
    """One-time fusion / padding / casting of the module parameters.

    Keeps the (D_img, 2*H_pad) weight concat + cast out of the per-call path.
    """
    H = params["wfi"].shape[1]
    H_pad = _round_up(H, 128)

    def pad_h(a):                       # (..., H) -> (..., H_pad), zero pad
        return jnp.pad(a, ((0, 0), (0, H_pad - H)))

    w_img = jnp.concatenate([pad_h(params["wfi"]), pad_h(params["wgi"])],
                            axis=1).astype(matmul_dtype)       # (D_img, 2H_pad)
    b_img = jnp.concatenate([pad_h(params["bfi"]), pad_h(params["bgi"])],
                            axis=1).astype(jnp.float32)        # (1, 2H_pad)
    w_txt = jnp.concatenate([params["wft"], params["wgt"]],
                            axis=1).astype(jnp.float32)        # (D_txt, 2H)
    b_txt = jnp.concatenate([params["bft"], params["bgt"]],
                            axis=1).astype(jnp.float32)        # (1, 2H)
    return {
        "w_img": w_img, "b_img": b_img,
        "w_txt": w_txt, "b_txt": b_txt,
        "wlc_vec": params["wlc"][:, 0].astype(jnp.float32),    # (H,)
        "H": H, "H_pad": H_pad,
        "matmul_dtype": matmul_dtype,
    }


def project_attention(image_feat, question_embedding, prep):
    f32 = jnp.float32
    B, L, D_img = image_feat.shape
    H, H_pad = prep["H"], prep["H_pad"]
    mdt = prep["matmul_dtype"]

    # ---- Question GatedTanh + lc fold (tiny (B, D_txt) work; plain XLA). ----
    zq = question_embedding.astype(f32) @ prep["w_txt"] + prep["b_txt"]
    q_fa = jnp.tanh(zq[:, :H]) * jax.nn.sigmoid(zq[:, H:])      # (B, H)
    v = q_fa * prep["wlc_vec"][None, :]                         # (B, H)
    v = jnp.pad(v, ((0, 0), (0, H_pad - H)))                    # (B, H_pad)
    v3 = v.reshape(B, 1, H_pad).astype(f32)

    img = image_feat.astype(mdt)

    vmem_limit = _vmem_limit_bytes()
    tk, resident = _plan(D_img, L, H_pad, jnp.dtype(mdt).itemsize, vmem_limit)
    kt = D_img // tk

    # When resident, the weight's index_map is constant over the whole grid and
    # Buffered(1) keeps a single copy in VMEM (loaded once, never re-streamed).
    w_kwargs = {"pipeline_mode": pl.Buffered(1)} if resident else {}

    grid_spec = pltpu.PrefetchScalarGridSpec(
        num_scalar_prefetch=0,
        grid=(B, kt),                                   # reduction axis (K) last
        in_specs=[
            pl.BlockSpec((1, L, tk), lambda b, k: (b, 0, k)),
            pl.BlockSpec((1, 1, H_pad), lambda b, k: (b, 0, 0)),
            pl.BlockSpec((tk, 2 * H_pad), lambda b, k: (k, 0), **w_kwargs),
            pl.BlockSpec((1, 2 * H_pad), lambda b, k: (0, 0)),
        ],
        out_specs=pl.BlockSpec((1, 1, L), lambda b, k: (b, 0, 0)),
        scratch_shapes=[pltpu.VMEM((L, 2 * H_pad), jnp.float32)],
    )

    att = pl.pallas_call(
        project_attention_kernel,
        out_shape=jax.ShapeDtypeStruct((B, 1, L), jnp.float32),
        grid_spec=grid_spec,
        compiler_params=pltpu.CompilerParams(
            dimension_semantics=("parallel", "arbitrary"),
            vmem_limit_bytes=vmem_limit),
    )(img, v3, prep["w_img"], prep["b_img"])

    # (B,1,L) -> (B,L,1) is a pure reinterpretation; expand_as(image_feat)
    # carries no information, so both stay outside the kernel (kernel HBM
    # writeback is B*L floats, not B*L*D_img).
    att = att.reshape(B, L, 1).astype(image_feat.dtype)
    return jnp.broadcast_to(att, image_feat.shape)


# ----------------------------------------------------------------------------
# Pure-JAX reference (mirrors the PyTorch module, eval mode)
# ----------------------------------------------------------------------------
def _reference(image_feat, question_embedding, params):
    def gated_tanh(x, wf, bf, wg, bg):
        return jnp.tanh(x @ wf + bf) * jax.nn.sigmoid(x @ wg + bg)

    img_fa = gated_tanh(image_feat, params["wfi"], params["bfi"],
                        params["wgi"], params["bgi"])           # (B, L, H)
    q_fa = gated_tanh(question_embedding, params["wft"], params["bft"],
                      params["wgt"], params["bgt"])             # (B, H)
    joint = img_fa * q_fa[:, None, :]                           # (B, L, H)
    raw = joint @ params["wlc"] + params["blc"]                 # (B, L, 1)
    att = jax.nn.softmax(raw, axis=1)                           # (B, L, 1)
    return jnp.broadcast_to(att, image_feat.shape)


if __name__ == "__main__":
    # Small shapes consistent with the module.
    B, L = 2, 16          # batch, num image locations
    D_img, D_txt, H = 32, 24, 32

    key = jax.random.PRNGKey(0)
    keys = jax.random.split(key, 12)

    params = {
        "wfi": 0.1 * jax.random.normal(keys[0], (D_img, H), jnp.float32),
        "bfi": 0.1 * jax.random.normal(keys[1], (1, H), jnp.float32),
        "wgi": 0.1 * jax.random.normal(keys[2], (D_img, H), jnp.float32),
        "bgi": 0.1 * jax.random.normal(keys[3], (1, H), jnp.float32),
        "wft": 0.1 * jax.random.normal(keys[4], (D_txt, H), jnp.float32),
        "bft": 0.1 * jax.random.normal(keys[5], (1, H), jnp.float32),
        "wgt": 0.1 * jax.random.normal(keys[6], (D_txt, H), jnp.float32),
        "bgt": 0.1 * jax.random.normal(keys[7], (1, H), jnp.float32),
        "wlc": 0.1 * jax.random.normal(keys[8], (H, 1), jnp.float32),
        "blc": 0.1 * jax.random.normal(keys[9], (1, 1), jnp.float32),
    }

    image_feat = jax.random.normal(keys[10], (B, L, D_img), jnp.float32)
    question_embedding = jax.random.normal(keys[11], (B, D_txt), jnp.float32)

    ref = _reference(image_feat, question_embedding, params)

    # f32 matmul path.
    prep_f32 = prepare_params(params, matmul_dtype=jnp.float32)
    out = project_attention(image_feat, question_embedding, prep_f32)
    out = jax.block_until_ready(out)
    assert out.shape == image_feat.shape
    assert out.dtype == image_feat.dtype
    assert jnp.allclose(out, ref, atol=1e-3, rtol=1e-3), "f32 mismatch vs reference"

    # bf16 matmul path (production choice for v6e/v7x; f32 accumulation).
    prep_bf16 = prepare_params(params, matmul_dtype=jnp.bfloat16)
    out_bf16 = project_attention(image_feat, question_embedding, prep_bf16)
    out_bf16 = jax.block_until_ready(out_bf16)
    assert jnp.allclose(out_bf16, ref, atol=2e-2, rtol=2e-2), "bf16 mismatch vs reference"

    print("KERNEL_OK")
</pallas_src>

<mosaic_0001>
module attributes {stable_mosaic.version = 11 : i64} {
  func.func @project_attention_kernel(%arg0: i32, %arg1: i32, %arg2: memref<1x16x32xf32, #tpu.memory_space<vmem>>, %arg3: memref<1x1x128xf32, #tpu.memory_space<vmem>>, %arg4: memref<32x256xf32, #tpu.memory_space<vmem>>, %arg5: memref<1x256xf32, #tpu.memory_space<vmem>>, %arg6: memref<1x1x16xf32, #tpu.memory_space<vmem>>, %arg7: memref<16x256xf32, #tpu.memory_space<vmem>>) attributes {dimension_semantics = [#tpu.dimension_semantics<parallel>, #tpu.dimension_semantics<arbitrary>], iteration_bounds = array<i64: 2, 1>, scalar_prefetch = 0 : i64, scratch_operands = 1 : i64, tpu.core_type = #tpu.core_type<tc>, window_params = [{transform_indices = @transform_0, window_bounds = array<i64: 1, 16, 32>}, {transform_indices = @transform_1, window_bounds = array<i64: 1, 1, 128>}, {pipeline_mode = #tpu.pipeline_mode<synchronous>, transform_indices = @transform_2, window_bounds = array<i64: 32, 256>}, {pipeline_mode = #tpu.pipeline_mode<synchronous>, transform_indices = @transform_3, window_bounds = array<i64: 1, 256>}, {transform_indices = @transform_4, window_bounds = array<i64: 1, 1, 16>}]} {
    %c0_i32 = arith.constant 0 : i32
    %0 = arith.cmpi eq, %arg1, %c0_i32 : i32
    %1 = arith.extui %0 : i1 to i32
    %c0_i32_0 = arith.constant 0 : i32
    %2 = arith.cmpi ne, %1, %c0_i32_0 : i32
    scf.if %2 {
      %cst_11 = arith.constant 0.000000e+00 : f32
      %13 = vector.broadcast %cst_11 : f32 to vector<16x256xf32>
      %c0_12 = arith.constant 0 : index
      %c0_13 = arith.constant 0 : index
      %14 = vector.load %arg7[%c0_12, %c0_13] : memref<16x256xf32, #tpu.memory_space<vmem>>, vector<16x256xf32>
      tpu.vector_store %arg7[%c0_12, %c0_13], %13 {strides = array<i32>} : memref<16x256xf32, #tpu.memory_space<vmem>>, vector<16x256xf32>,
    } else {
    }
    %c0 = arith.constant 0 : index
    %c0_1 = arith.constant 0 : index
    %3 = vector.load %arg7[%c0, %c0_1] : memref<16x256xf32, #tpu.memory_space<vmem>>, vector<16x256xf32>
    %c0_2 = arith.constant 0 : index
    %c0_3 = arith.constant 0 : index
    %c0_4 = arith.constant 0 : index
    %4 = vector.load %arg2[%c0_2, %c0_3, %c0_4] : memref<1x16x32xf32, #tpu.memory_space<vmem>>, vector<1x16x32xf32>
    %5 = vector.shape_cast %4 : vector<1x16x32xf32> to vector<16x32xf32>
    %c0_5 = arith.constant 0 : index
    %c0_6 = arith.constant 0 : index
    %6 = vector.load %arg4[%c0_5, %c0_6] : memref<32x256xf32, #tpu.memory_space<vmem>>, vector<32x256xf32>
    %cst = arith.constant dense<0.000000e+00> : vector<16x256xf32>
    %7 = tpu.matmul %5, %6, %cst {dimension_numbers = #tpu.dot_dimension_numbers<[1], [0], [0], [1], [0, 0, 1, 1], [], []>} : vector<16x32xf32>, vector<32x256xf32>, vector<16x256xf32> -> vector<16x256xf32>
    %8 = arith.addf %3, %7 : vector<16x256xf32>
    %c0_7 = arith.constant 0 : index
    %c0_8 = arith.constant 0 : index
    %9 = vector.load %arg7[%c0_7, %c0_8] : memref<16x256xf32, #tpu.memory_space<vmem>>, vector<16x256xf32>
    tpu.vector_store %arg7[%c0_7, %c0_8], %8 {strides = array<i32>} : memref<16x256xf32, #tpu.memory_space<vmem>>, vector<16x256xf32>,
    %c0_i32_9 = arith.constant 0 : i32
    %10 = arith.cmpi eq, %arg1, %c0_i32_9 : i32
    %11 = arith.extui %10 : i1 to i32
    %c0_i32_10 = arith.constant 0 : i32
    %12 = arith.cmpi ne, %11, %c0_i32_10 : i32
    scf.if %12 {
      %c0_11 = arith.constant 0 : index
      %c0_12 = arith.constant 0 : index
      %13 = vector.load %arg7[%c0_11, %c0_12] : memref<16x256xf32, #tpu.memory_space<vmem>>, vector<16x256xf32>
      %c0_13 = arith.constant 0 : index
      %c0_14 = arith.constant 0 : index
      %14 = vector.load %arg5[%c0_13, %c0_14] : memref<1x256xf32, #tpu.memory_space<vmem>>, vector<1x256xf32>
      %15 = vector.broadcast %14 : vector<1x256xf32> to vector<16x256xf32>
      %16 = arith.addf %13, %15 : vector<16x256xf32>
      %17 = vector.extract_strided_slice %16 {offsets = [0, 0], sizes = [16, 128], strides = [1, 1]} : vector<16x256xf32> to vector<16x128xf32>
      %18 = math.tanh %17 : vector<16x128xf32>
      %19 = vector.extract_strided_slice %16 {offsets = [0, 128], sizes = [16, 128], strides = [1, 1]} : vector<16x256xf32> to vector<16x128xf32>
      %20 = arith.negf %19 : vector<16x128xf32>
      %21 = math.exp %20 : vector<16x128xf32>
      %cst_15 = arith.constant 1.000000e+00 : f32
      %22 = vector.broadcast %cst_15 : f32 to vector<16x128xf32>
      %23 = arith.addf %22, %21 : vector<16x128xf32>
      %24 = arith.divf %22, %23 : vector<16x128xf32>
      %25 = arith.mulf %18, %24 : vector<16x128xf32>
      %c0_16 = arith.constant 0 : index
      %c0_17 = arith.constant 0 : index
      %c0_18 = arith.constant 0 : index
      %26 = vector.load %arg3[%c0_16, %c0_17, %c0_18] : memref<1x1x128xf32, #tpu.memory_space<vmem>>, vector<1x1x128xf32>
      %27 = vector.shape_cast %26 : vector<1x1x128xf32> to vector<1x128xf32>
      %cst_19 = arith.constant dense<0.000000e+00> : vector<1x16xf32>
      %28 = tpu.matmul %27, %25, %cst_19 {dimension_numbers = #tpu.dot_dimension_numbers<[1], [1], [0], [0], [0, 0, 1, 0], [], []>} : vector<1x128xf32>, vector<16x128xf32>, vector<1x16xf32> -> vector<1x16xf32>
      %cst_20 = arith.constant dense<0xFF800000> : vector<1xf32>
      %29 = vector.multi_reduction <maximumf>, %28, %cst_20 [1] : vector<1x16xf32> to vector<1xf32>
      %30 = vector.shape_cast %29 : vector<1xf32> to vector<1x1xf32>
      %31 = vector.broadcast %30 : vector<1x1xf32> to vector<1x16xf32>
      %32 = arith.subf %28, %31 : vector<1x16xf32>
      %33 = math.exp %32 : vector<1x16xf32>
      %cst_21 = arith.constant dense<0.000000e+00> : vector<1xf32>
      %34 = vector.multi_reduction <add>, %33, %cst_21 [1] : vector<1x16xf32> to vector<1xf32>
      %35 = vector.shape_cast %34 : vector<1xf32> to vector<1x1xf32>
      %36 = vector.broadcast %35 : vector<1x1xf32> to vector<1x16xf32>
      %37 = arith.divf %33, %36 : vector<1x16xf32>
      %c0_22 = arith.constant 0 : index
      %c0_23 = arith.constant 0 : index
      %c0_24 = arith.constant 0 : index
      %38 = vector.load %arg6[%c0_22, %c0_23, %c0_24] : memref<1x1x16xf32, #tpu.memory_space<vmem>>, vector<1x1x16xf32>
      %39 = vector.shape_cast %38 : vector<1x1x16xf32> to vector<1x16xf32>
      %40 = vector.shape_cast %37 : vector<1x16xf32> to vector<1x1x16xf32>
      tpu.vector_store %arg6[%c0_22, %c0_23, %c0_24], %40 {strides = array<i32>} : memref<1x1x16xf32, #tpu.memory_space<vmem>>, vector<1x1x16xf32>,
    } else {
    }
    return
  }
  func.func @transform_0(%arg0: i32, %arg1: i32) -> (i32, i32, i32) {
    %c0_i32 = arith.constant 0 : i32
    %c0_i32_0 = arith.constant 0 : i32
    return %arg0, %c0_i32, %arg1 : i32, i32, i32
  }
  func.func @transform_1(%arg0: i32, %arg1: i32) -> (i32, i32, i32) {
    %c0_i32 = arith.constant 0 : i32
    %c0_i32_0 = arith.constant 0 : i32
    %c0_i32_1 = arith.constant 0 : i32
    return %arg0, %c0_i32, %c0_i32_0 : i32, i32, i32
  }
  func.func @transform_2(%arg0: i32, %arg1: i32) -> (i32, i32) {
    %c0_i32 = arith.constant 0 : i32
    %c0_i32_0 = arith.constant 0 : i32
    return %arg1, %c0_i32 : i32, i32
  }
  func.func @transform_3(%arg0: i32, %arg1: i32) -> (i32, i32) {
    %c0_i32 = arith.constant 0 : i32
    %c0_i32_0 = arith.constant 0 : i32
    %c0_i32_1 = arith.constant 0 : i32
    return %c0_i32, %c0_i32_0 : i32, i32
  }
  func.func @transform_4(%arg0: i32, %arg1: i32) -> (i32, i32, i32) {
    %c0_i32 = arith.constant 0 : i32
    %c0_i32_0 = arith.constant 0 : i32
    %c0_i32_1 = arith.constant 0 : i32
    return %arg0, %c0_i32, %c0_i32_0 : i32, i32, i32
  }
}

</mosaic_0001>

<bundles_post_ra>
// kernel: tpu_custom_call.1
= control target key start
LH: loop header
LB: loop body
LE: loop exit
PB: predicated region body
PF: predicated region fallthrough
CT: control target
= control target key end

     0   :  { %9 = vsyncpa [#allocation4], 0  ;;  %s1162_s0 = inlined_call_operand.hbm [shape: f32[2,16,32], index: 0, kind: input, shape index: {}]   ;;  %s1163_s1 = inlined_call_operand.vmem [shape: f32[2,1,128], index: 1, kind: input, shape index: {}]   ;;  %s1164_s2 = inlined_call_operand.hbm [shape: f32[32,256], index: 2, kind: input, shape index: {}]   ;;  %s1165_s3 = inlined_call_operand.vmem [shape: f32[1,256], index: 3, kind: input, shape index: {}]   ;;  %s1166_s4 = inlined_call_operand.hbm [shape: f32[2,1,16], index: 4, kind: output, shape index: {}]  }
   0x1   :  { %11 = vsyncpa [#allocation4 + $0x1], 0 }
   0x2   :  { %12 = vsyncpa [#allocation7], 0 }
   0x3   :  { %13 = vsyncpa [#allocation5], 0 }
   0x4   :  { %15 = vsyncpa [#allocation5 + $0x1], 0  ;;  %s933_s15 = smov 0   ;;  %s935_s16 = smov 0  }
   0x5   :  { %s937_s17 = smov 0   ;;  %s939_s18 = smov 0  }
   0x6   :  { %s941_s19 = smov 0   ;;  %s943_s20 = smov 0  }
   0x7 LB: > { %s616_s21 = sadd.s32 4294967295, %s896_s20   ;;  %s617_s22 = sadd.s32 4294967294, %s896_s20   ;;  %s896_s20 = sphi %s943_s20, %s21_s20   ;;  %s892_s19 = sphi %s941_s19, %s1190_s19   ;;  %s888_s18 = sphi %s939_s18, %s1189_s18   ;;  %s884_s17 = sphi %s937_s17, %s1188_s17   ;;  %s880_s16 = sphi %s935_s16, %s1187_s16   ;;  %s876_s15 = sphi %s933_s15, %s1186_s15  }
   0x8   : > { %p55_p0 = scmp.ne.s32.totalorder %s880_s16, %s876_s15  ;;  %p967_p1 = scmp.eq.s32.totalorder %s616_s21, 0 }
   0x9   : > { %p971_p2 = scmp.eq.s32.totalorder %s616_s21, 1  ;;  %p158_p3 = scmp.eq.s32.totalorder %s617_s22, 1 }
   0xa   : > { %s1171_s23 = scalar_select %p967_p1, 1, 0 }
   0xb   : > { %s1172_s24 = scalar_select %p971_p2, 1, 0 }
   0xc   : > { %p977_p4 = por %p967_p1, %p55_p0  ;;  %p618_p5 = scmp.ge.s32.totalorder %s896_s20, 1 }
   0xd   : > { %p982_p6 = por %p158_p3, %p55_p0  ;;  %p165_p7 = scmp.lt.s32.totalorder %s896_s20, 3 }
   0xe   : > { %s1173_s25 = scalar_select %p977_p4, 1, 0 }
   0xf   : > { %s1174_s26 = scalar_select %p982_p6, 1, 0 }
  0x10   : > { %p987_p8 = pnand %p618_p5, %p165_p7  ;;  %s898_s28 = smov [#allocation6]  }
  0x11   : > { %s181_s29 = sshll.u32 %s898_s28, 4  ;;  %s33_s5 = sadd.s32 1, %s892_s19  ;;  %s182_s29 = int_to_ptr.vmem [resolvable:$true] %s181_s29 }
  0x12   : > { %s1175_s27 = scalar_select %p987_p8, 1, 0 }
  0x13   : > { %p664_p9 = pneg %p987_p8  ;;  %s752_s8 = scalar_lea.hbm %s1164_s2, 1024 }
  0x14   : > { %p753_p12 = scmp.ne.s32.totalorder %s1164_s2, %s752_s8  ;;  %p759_p5 = scmp.lt.u32.totalorder %s752_s8, %s1164_s2 }
  0x15   : > { %p996_p11 = pnand %p664_p9, %p967_p1 }
  0x17   : > { %p754_p13 = pneg %p996_p11 }
  0x19   : > { %p755_p0 = pnand %p754_p13, %p753_p12 }
  0x1b   : > { %p756_p3 = pneg %p755_p0 }
  0x1d   : > { %p761_p7 = pnand %p759_p5, %p756_p3 }
  0x1f   : > { %764 = shalt.err (!%p761_p7)
}
  0x20   : > { %s765_s13 = scalar_lea.vmem %s182_s29, 1024  ;;  %p773_p1 = scmp.lt.s32.totalorder %s182_s29, %s182_s29 }
  0x21   : > { %p766_p9 = scmp.ne.s32.totalorder %s182_s29, %s765_s13  ;;  %p774_p4 = scmp.lt.s32.totalorder %s765_s13, %s765_s13 }
  0x23   : > { %p768_p10 = pnand %p766_p9, %p754_p13  ;;  %p775_p8 = por %p774_p4, %p773_p1 }
  0x25   : > { %p769_p6 = pneg %p768_p10 }
  0x27   : > { %p776_p2 = pnand %p775_p8, %p769_p6 }
  0x29   : > { %779 = shalt.err (!%p776_p2)
}
  0x2a   : > { %s899_s14 = smov 256   ;;  %s900_s21 = smov 16  }
  0x2b   : > { %667 = dma.hbm_to_vmem [thread:$0]  (!%p996_p11), %s1164_s2, 1024, %s182_s29, [#allocation7], %s899_s14, %s899_s14, %s900_s21  }
  0x2c   : > { %p35_p1 = scmp.ge.s32.totalorder %s33_s5, 2  ;;  %s42_s6 = sadd.s32 1, %s884_s17 }
  0x2d   : > { %p49_p2 = scmp.ne.s32.totalorder %s884_s17, %s880_s16  ;;  %p50_p4 = scmp.eq.s32.totalorder %s896_s20, 0 }
  0x2e   : > { %s1192_s5 = smov (%p35_p1, %s33_s5), 0  ;;  %p1178_p8 = scmp.ne.s32.totalorder %s1172_s24, 0 }
  0x2f   : > { %p1023_p6 = por %p50_p4, %p49_p2  ;;  %s37_s30 = ssub.s32 %s892_s19, %s1192_s5 }
  0x30   : > { %p1029_p10 = por %p1178_p8, %p49_p2  ;;  %p677_p12 = scmp.lt.s32.totalorder %s896_s20, 2 }
  0x31   : > { %p40_p11 = scmp.eq.s32.totalorder %s37_s30, 0  ;;  %s198_s29 = sand.u32 1, %s884_s17  }
  0x32   : > { %s621_s9 = sshll.u32 %s198_s29, 4  ;;  %s634_s11 = sshll.u32 %s892_s19, 8 }
  0x33   : > { %s1038_s10 = scalar_select %p40_p11, %s884_s17, %s42_s6  }
  0x34   : > { %s1044_s14 = scalar_lea.hbm %s1162_s0, %s634_s11  ;;  %s202_s24 = scalar_lea.vmem [#allocation3], %s621_s9 }
  0x35   : > { %s210_s21 = sshll.u32 %s202_s24, 4  ;;  %p1050_p13 = pnand %p677_p12, %p1023_p6  ;;  %s1046_s21 = int_to_ptr.vmem [resolvable:$true] %s210_s21 }
  0x36   : > { %s1054_s28 = scalar_lea.sflag [#allocation4], %s198_s29  ;;  %s780_s6 = scalar_lea.hbm %s1044_s14, 256 }
  0x37   : > { %p781_p0 = scmp.ne.s32.totalorder %s1044_s14, %s780_s6  ;;  %p782_p3 = pneg %p1050_p13 }
  0x38   : > { %s785_s7 = scalar_lea.hbm %s1162_s0, 512  ;;  %p786_p9 = scmp.lt.u32.totalorder %s1044_s14, %s1162_s0 }
  0x39   : > { %p783_p5 = pnand %p782_p3, %p781_p0  ;;  %p787_p1 = scmp.lt.u32.totalorder %s785_s7, %s780_s6 }
  0x3a   : > { %p789_p4 = scmp.lt.u32.totalorder %s780_s6, %s1044_s14 }
  0x3b   : > { %p784_p7 = pneg %p783_p5  ;;  %p788_p2 = por %p787_p1, %p786_p9 }
  0x3d   : > { %p790_p6 = por %p789_p4, %p788_p2 }
  0x3f   : > { %p791_p8 = pnand %p790_p6, %p784_p7 }
  0x41   : > { %794 = shalt.err (!%p791_p8)
}
  0x42   : > { %s795_s29 = scalar_lea.vmem %s1046_s21, 256  ;;  %s901_s13 = smov [#allocation3]  }
  0x43   : > { %p796_p12 = scmp.ne.s32.totalorder %s1046_s21, %s795_s29  ;;  %s800_s24 = sshll.u32 %s901_s13, 4  ;;  %s801_s24 = int_to_ptr.vmem [resolvable:$false] %s800_s24 }
  0x44   : > { %s802_s30 = scalar_lea.vmem %s801_s24, 512  ;;  %p803_p5 = scmp.lt.s32.totalorder %s1046_s21, %s801_s24 }
  0x45   : > { %p798_p11 = pnand %p796_p12, %p782_p3  ;;  %p804_p9 = scmp.lt.s32.totalorder %s802_s30, %s795_s29 }
  0x47   : > { %p799_p0 = pneg %p798_p11  ;;  %p805_p1 = por %p804_p9, %p803_p5 }
  0x49   : > { %p806_p2 = pnand %p805_p1, %p799_p0 }
  0x4b   : > { %809 = shalt.err (!%p806_p2)
}
  0x4c   : > { %s902_s6 = smov 128   ;;  %s903_s9 = smov 8  }
  0x4d   : > { %671 = dma.hbm_to_vmem [thread:$0]  (!%p1050_p13), %s1044_s14, 256, %s1046_s21, %s1054_s28, %s902_s6, %s902_s6, %s903_s9  }
  0x4e   : > { %p1181_p3 = scmp.ne.s32.totalorder %s1175_s27, 0 }
  0x4f   : > { %s1085_s7 = sand.u32 (!%p1181_p3), 1, %s880_s16   ;;  %p1182_p7 = scmp.ne.s32.totalorder (!%p1181_p3), %s1173_s25, 0 }
  0x50   : > { %228 = sbr.rel (%p1181_p3) target bundleno = 898 (0x382), region = 36  ;;  %s625_s11 = sshll.u32 (!%p1181_p3), %s1085_s7, 4 }
  0x51   : > { %s231_s12 = scalar_lea.sflag (!%p1181_p3), [#allocation4], %s1085_s7  ;;  %s234_s29 = scalar_lea.vmem (!%p1181_p3), [#allocation3], %s625_s11 }
  0x57   : > { %863 = dma.done.wait (%p1182_p7), %s231_s12, 256  }
  0x58   : > { %865 = vsyncadd (%p1182_p7), %s231_s12, 4294967040  ;;  %p1183_p4 = scmp.ne.s32.totalorder %s1171_s23, 0 }
  0x5a   : > { %867 = dma.done.wait (%p1183_p4), [#allocation7], 1024  }
  0x5b   : > { %869 = vsyncadd (%p1183_p4), [#allocation7], 4294966272  ;;  %v904_v0 = vmov 0.0   ;;  %v284_v1 = vld [vmem:[#allocation6 + $0x8] sm:$0xff]  ;;  %v286_v2 = vld [vmem:[#allocation6 + $0x18] sm:$0xff]  ;;  %vm291_vm0 = vcmask 261120   ;;  %v392_v16 = vlaneseq }
  0x5c   : > { %362 = vmatprep.mubr.f32.mxu0 %v904_v0  ;;  %v283_v3 = vld [vmem:[#allocation6] sm:$0xff]  ;;  %v645_v4 = vpack.c.bf16 %v286_v2, %v284_v1  ;;  %v285_v5 = vld [vmem:[#allocation6 + $0x10] sm:$0xff]  ;;  %v288_v6 = vld [vmem:[#allocation6 + $0x28] sm:$0xff]  ;;  %v905_v15 = vmov 0.0|0.0   ;;  %vm906_vm1 = vmmov 0   ;;  %p265_p13 = scmp.lt.s32.totalorder %s888_s18, 1 }
  0x5d   : > { %v290_v7 = vld [vmem:[#allocation6 + $0x38] sm:$0xff]  ;;  %v647_v8 = vpack.c.bf16 %v285_v5, %v283_v3  ;;  %v287_v10 = vld [vmem:[#allocation6 + $0x20] sm:$0xff]  ;;  %v289_v11 = vld [vmem:[#allocation6 + $0x30] sm:$0xff]  ;;  %653 = vmatprep.subr.bf16.mxu1 %v905_v15  ;;  %642 = vmatprep.mubr.msk.f32.mxu1 %vm906_vm1, %v904_v0  ;;  %v393_v17 = vshrl.u32 %v392_v16, 7  ;;  %vm493_vm2 = vcmask 122880   ;;  %s631_s28 = sshll.u32 %s888_s18, 4 }
  0x5e   : > { %v649_v9 = vpack.c.bf16 %v290_v7, %v288_v6  ;;  %646 = vmatprep.subr.bf16.mxu0 %v645_v4  ;;  %v651_v12 = vpack.c.bf16 %v289_v11, %v287_v10  ;;  %v281_v13 = vld [vmem:[%s234_s29] sm:$0xff]  ;;  %v282_v14 = vld [vmem:[%s234_s29 + $0x8] sm:$0xff]  ;;  %s266_s27 = scalar_select %p265_p13, %s888_s18, 1 }
  0x5f   : > { %648 = vmatpush1.bf16.msra.mxu0 %v647_v8  ;;  %v398_v18 = vsub.s32 1, %v393_v17  ;;  %v390_v19 = vld [vmem:[%s1165_s3] sm:$0x3]  ;;  %v394_v27 = vsub.s32 0, %v393_v17  ;;  %s264_s13 = scalar_lea.vmem [#allocation8], %s1085_s7  ;;  %s1112_s9 = scalar_lea.hbm %s1166_s4, %s631_s28 }
  0x60   : > { %650 = vmatprep.subr.bf16.mxu0 %v649_v9  ;;  %s267_s22 = scalar_lea.vmem %s1163_s1, %s266_s27  ;;  %s519_s24 = sshll.u32 %s264_s13, 4  ;;  %s1114_s24 = int_to_ptr.vmem [resolvable:$true] %s519_s24 }
  0x61   : > { %v399_v20 = vrot.slane %v390_v19, %v398_v18  ;;  %v395_v30 = vrot.slane %v390_v19, %v394_v27  ;;  %v422_v44 = vld [vmem:[%s267_s22] sm:$0x1]  ;;  %s507_s11 = scalar_lea.sflag [#allocation5], %s1085_s7  ;;  %s810_s12 = scalar_lea.vmem %s1114_s24, 16 }
  0x62   : > { %p811_p6 = scmp.ne.s32.totalorder %s1114_s24, %s810_s12  ;;  %s907_s18 = smov [#allocation8]  }
  0x63   : > { %652 = vmatpush1.bf16.msra.mxu0 %v651_v12  ;;  %s814_s29 = sshll.u32 %s907_s18, 4  ;;  %s815_s29 = int_to_ptr.vmem [resolvable:$false] %s814_s29 }
  0x64   : > { %p812_p8 = pnand %p811_p6, %p1029_p10  ;;  %s816_s23 = scalar_lea.vmem %s815_s29, 32 }
  0x65   : > { %p817_p11 = scmp.lt.s32.totalorder %s1114_s24, %s815_s29  ;;  %p818_p0 = scmp.lt.s32.totalorder %s816_s23, %s810_s12 }
  0x66   : > { %627 = vmatmul.mubr.msk.f32.vlgmr.msra.gmra.mrb[0].mxu0 %vm291_vm0, %v281_v13  ;;  %p813_p12 = pneg %p812_p8 }
  0x67   : > { %368 = vmatprep.mubr.f32.mxu0 %v904_v0  ;;  %p819_p5 = por %p818_p0, %p817_p11 }
  0x69   : > { %p820_p9 = pnand %p819_p5, %p813_p12 }
  0x6a   : > { %628 = vmatmul.mubr.msk.f32.gmra.mrb[2].mxu0 %vm291_vm0, %v282_v14 }
 0x139   : > { %v364_v21 = vpop.f32.mrb[0].mxu0 }
 0x13a   : > { %v366_v22 = vpop.f32.mrb[1].mxu0  ;;  %v402_v31 = vadd.f32 %v395_v30, %v364_v21 }
 0x13b   : > { %v403_v23 = vadd.f32 %v399_v20, %v366_v22 }
 0x13d   : > { %v629_v24 = vmul.f32 -1.442695, %v403_v23  ;;  %v370_v25 = vpop.f32.mrb[2].mxu0 }
 0x13e   : > { %v372_v26 = vpop.f32.mrb[3].mxu0  ;;  %v404_v34 = vadd.f32 %v395_v30, %v370_v25 }
 0x13f   : > { %736 = vpow2.f32 %v629_v24  ;;  %v405_v28 = vadd.f32 %v399_v20, %v372_v26 }
 0x141   : > { %v630_v29 = vmul.f32 -1.442695, %v405_v28 }
 0x143   : > { %738 = vpow2.f32 %v630_v29 }
 0x144   : > { %740 = vtanh.f32 %v402_v31 }
 0x149   : > { %v737_v32 = vpop.eup %736 }
 0x14a   : > { %v414_v33 = vadd.f32 1.0, %v737_v32 }
 0x14c   : > { %742 = vrcp.f32 %v414_v33 }
 0x14d   : > { %v739_v35 = vpop.eup %738  ;;  %744 = vtanh.f32 %v404_v34 }
 0x14e   : > { %v415_v36 = vadd.f32 1.0, %v739_v35  ;;  %v741_v37 = vpop.eup %740 }
 0x150   : > { %746 = vrcp.f32 %v415_v36 }
 0x156   : > { %v743_v38 = vpop.eup %742 }
 0x157   : > { %v420_v39 = vmul.f32 %v743_v38, %v741_v37  ;;  %v745_v40 = vpop.eup %744 }
 0x15a   : > { %v747_v41 = vpop.eup %746 }
 0x15b   : > { %v421_v42 = vmul.f32 %v747_v41, %v745_v40 }
 0x15d   : > { %v654_v43 = vpack.c.bf16 %v421_v42, %v420_v39 }
 0x15f   : > { %655 = vmatpush3.bf16.xpose.msra.mxu1 %v654_v43 }
 0x166   : > { %643 = vmatmul.mubr.f32.vlgmr.msra.gmra.mrb[0].mxu1 %v422_v44 }
 0x239   : > { %v489_v45 = vpop.f32.mrb[0].mxu1 }
 0x23a   : > { %v644_v46 = vpop.f32.mrb[1].mxu1  ;;  %v494_v47 = vsel %vm493_vm2, %v489_v45, -inf }
 0x23b   : > { %495 = vmax.xlane.f32.xlu0 %v494_v47 }
 0x2c8   : > { %v496_v48 = vpop.xlane.xlu0 %495 }
 0x2c9   : > { %v497_v49 = vsub.f32 %v489_v45, %v496_v48 }
 0x2cb   : > { %v498_v50 = vmul.f32 1.442695, %v497_v49 }
 0x2cd   : > { %748 = vpow2.f32 %v498_v50 }
 0x2d7   : > { %v749_v51 = vpop.eup %748 }
 0x2d8   : > { %v500_v52 = vsel %vm493_vm2, %v749_v51, 0.0 }
 0x2d9   : > { %501 = vadd.xlane.f32.xlu0 %v500_v52 }
 0x366   : > { %v502_v53 = vpop.xlane.xlu0 %501 }
 0x367   : > { %750 = vrcp.f32 %v502_v53 }
 0x371   : > { %v751_v54 = vpop.eup %750 }
 0x372   : > { %v504_v55 = vmul.f32 %v751_v54, %v749_v51 }
 0x374   : > { %505 = vst.msk [vmem:[%s264_s13] sm:$0x1] %vm493_vm2, %v504_v55 }
 0x375   : > { %823 = shalt.err (!%p820_p9)
}
 0x376   : > { %s824_s7 = scalar_lea.hbm %s1112_s9, 16  ;;  %s828_s14 = scalar_lea.hbm %s1166_s4, 32 }
 0x377   : > { %p825_p1 = scmp.ne.s32.totalorder %s1112_s9, %s824_s7  ;;  %p829_p7 = scmp.lt.u32.totalorder %s1112_s9, %s1166_s4 }
 0x378   : > { %p830_p4 = scmp.lt.u32.totalorder %s828_s14, %s824_s7  ;;  %p832_p6 = scmp.lt.u32.totalorder %s824_s7, %s1112_s9 }
 0x379   : > { %p826_p2 = pnand %p825_p1, %p1029_p10 }
 0x37a   : > { %p831_p13 = por %p830_p4, %p829_p7 }
 0x37b   : > { %p827_p3 = pneg %p826_p2 }
 0x37c   : > { %p833_p8 = por %p832_p6, %p831_p13 }
 0x37e   : > { %p834_p12 = pnand %p833_p8, %p827_p3 }
 0x380   : > { %837 = shalt.err (!%p834_p12)
}
 0x381   : > { %662 = dma.vmem_to_hbm [thread:$0]  (%p1029_p10), %s1114_s24, 16, %s1112_s9, %s507_s11  }
 0x382 PF: > { %s531_s28 = sand.u32 1, %s876_s15   ;;  %p1184_p11 = scmp.ne.s32.totalorder %s1174_s26, 0 }
 0x383   : > { %p1185_p0 = scmp.ge.s32.totalorder %s896_s20, 2  ;;  %s532_s13 = scalar_lea.sflag [#allocation5], %s531_s28 }
 0x385   : > { %p673_p5 = pnand %p1185_p0, %p1184_p11 }
 0x387   : > { %871 = dma.done.wait (!%p673_p5), %s532_s13, 16  }
 0x388   : > { %873 = vsyncadd (!%p673_p5), %s532_s13, 4294967280  ;;  %s21_s20 = sadd.s32 1, %s896_s20   ;;  %s1186_s15 = smov %s880_s16 }
 0x389   : > { %p18_p9 = scmp.ge.s32.totalorder %s21_s20, 4   ;;  %s1187_s16 = smov %s884_s17 }
 0x38a   : > { %s1188_s17 = smov %s1038_s10  ;;  %s1189_s18 = smov %s892_s19 }
 0x38b   : > { %s1190_s19 = smov %s1192_s5  ;;  %20 = sbr.rel (!%p18_p9) target bundleno = 7 (0x7), region = 97 }
 0x392   :  { %536 = vsyncpa [#allocation4], 1 }
 0x393   :  { %538 = vsyncpa [#allocation4 + $0x1], 1 }
 0x394   :  { %539 = vsyncpa [#allocation7], 1 }
 0x395   :  { %540 = vsyncpa [#allocation5], 1 }
 0x396   :  { %542 = vsyncpa [#allocation5 + $0x1], 1 }

</bundles_post_ra>
